<compile_context>
chip_gen: v5e
topology: v5e:2x2
jax: 0.10.0
libtpu: 0.0.40
codegen_flags: <defaults>
</compile_context>

<pallas_src>
import jax
import jax.numpy as jnp
from jax.experimental import pallas as pl
from jax.experimental.pallas import tpu as pltpu

EPS = 1e-5  # nn.LayerNorm default


# ----------------------------------------------------------------------------
# Tiling / VMEM budgeting helpers (all trace-time Python on static shapes).
# ----------------------------------------------------------------------------
def _sublane(dtype):
    # bf16/f16 pack 16 rows per vreg, f32 packs 8.
    return 16 if jnp.dtype(dtype).itemsize <= 2 else 8


def _round_up(x, m):
    return ((x + m - 1) // m) * m


def _round_down_pos(x, m):
    return max(m, (x // m) * m)


def _vmem_phys_bytes():
    try:
        return int(pltpu.get_tpu_info().vmem_capacity_bytes)
    except Exception:
        return 64 << 20  # conservative default (v7x per-TC VMEM)


def _vmem_budget_bytes():
    # Budget ~half of physical VMEM for pipelined tiles:
    # ~32 MiB on v7x (64 MiB VMEM), ~64 MiB on v5e/v6e (128 MiB VMEM).
    return _vmem_phys_bytes() // 2


def _vmem_limit_bytes(tile_bytes):
    phys = _vmem_phys_bytes()
    return int(max(32 << 20, min(phys - (8 << 20), tile_bytes + (16 << 20))))


# ----------------------------------------------------------------------------
# Generic LayerNorm kernel (normalizes the trailing `dim` axis).
# ----------------------------------------------------------------------------
def _layernorm_kernel(x_ref, g_ref, b_ref, o_ref):
    # x_ref: (row_tile, dim)   g_ref/b_ref: (1, dim)
    x = x_ref[...].astype(jnp.float32)
    mean = jnp.mean(x, axis=-1, keepdims=True)
    centered = x - mean
    var = jnp.mean(centered * centered, axis=-1, keepdims=True)
    inv = jax.lax.rsqrt(var + EPS)
    y = centered * inv * g_ref[...] + b_ref[...]
    o_ref[...] = y.astype(o_ref.dtype)


def _pick_row_tile(rows, dim, dtype):
    sub = _sublane(dtype)
    itemsize = jnp.dtype(dtype).itemsize
    # Per row: double-buffered input + output tiles plus ~one f32 working copy.
    bytes_per_row = dim * (4 * itemsize + 4)
    row_tile = _vmem_budget_bytes() // max(bytes_per_row, 1)
    row_tile = min(row_tile, 2048)                      # diminishing returns
    row_tile = min(row_tile, _round_up(max(rows, 1), sub))
    if rows >= 2 * sub:  # keep >=2 grid steps so v7x can use both TensorCores
        row_tile = min(row_tile, _round_up(pl.cdiv(rows, 2), sub))
    return max(sub, _round_down_pos(row_tile, sub))


@jax.jit
def layernorm_pallas(x, gamma, beta):
    """LayerNorm over the last axis of x (any leading shape)."""
    orig_shape = x.shape
    dim = orig_shape[-1]
    rows = 1
    for s in orig_shape[:-1]:
        rows *= s
    x2 = x.reshape(rows, dim)
    g2 = gamma.reshape(1, dim).astype(jnp.float32)
    b2 = beta.reshape(1, dim).astype(jnp.float32)

    # NOTE: for best store-side throughput `dim` should be a multiple of 128
    # (lane-dense stores); smaller dims still work but use masked stores.
    row_tile = _pick_row_tile(rows, dim, x.dtype)
    padded_rows = _round_up(rows, row_tile)
    if padded_rows != rows:
        x2 = jnp.pad(x2, ((0, padded_rows - rows), (0, 0)))

    itemsize = jnp.dtype(x.dtype).itemsize
    tile_bytes = row_tile * dim * (4 * itemsize + 4)

    out = pl.pallas_call(
        _layernorm_kernel,
        out_shape=jax.ShapeDtypeStruct((padded_rows, dim), x.dtype),
        grid_spec=pltpu.PrefetchScalarGridSpec(
            num_scalar_prefetch=0,
            grid=(padded_rows // row_tile,),
            in_specs=[
                pl.BlockSpec((row_tile, dim), lambda i: (i, 0)),
                pl.BlockSpec((1, dim), lambda i: (0, 0)),
                pl.BlockSpec((1, dim), lambda i: (0, 0)),
            ],
            out_specs=pl.BlockSpec((row_tile, dim), lambda i: (i, 0)),
        ),
        compiler_params=pltpu.CompilerParams(
            dimension_semantics=("parallel",),
            vmem_limit_bytes=_vmem_limit_bytes(tile_bytes),
        ),
    )(x2, g2, b2)

    if padded_rows != rows:
        out = out[:rows]
    return out.reshape(orig_shape)


# ----------------------------------------------------------------------------
# Fused PreNorm + Linear kernel: normalize the (tm, dim) LHS tile in VMEM,
# then feed the MXU — no HBM round-trip for the normed activations.
# ----------------------------------------------------------------------------
def _prenorm_linear_kernel(x_ref, g_ref, b_ref, w_ref, wb_ref, o_ref):
    # x_ref: (tm, dim)  g/b: (1, dim)  w_ref: (dim, tn)  wb_ref: (1, tn)
    x = x_ref[...].astype(jnp.float32)
    mean = jnp.mean(x, axis=-1, keepdims=True)
    centered = x - mean
    var = jnp.mean(centered * centered, axis=-1, keepdims=True)
    y = centered * jax.lax.rsqrt(var + EPS) * g_ref[...] + b_ref[...]
    acc = jnp.dot(
        y.astype(w_ref.dtype), w_ref[...],
        preferred_element_type=jnp.float32,
        precision=jax.lax.Precision.HIGHEST,
    )
    o_ref[...] = (acc + wb_ref[...]).astype(o_ref.dtype)


def _pick_fused_tiles(rows, dim, n, x_dtype, w_dtype):
    sub = _sublane(x_dtype)
    xb = jnp.dtype(x_dtype).itemsize
    wb = jnp.dtype(w_dtype).itemsize
    budget = _vmem_budget_bytes()
    tn = min(n, 512)
    while n % tn:            # n is a multiple of 128 on this path
        tn //= 2
    w_bytes = 2 * dim * tn * wb
    per_row = dim * (2 * xb + 4) + tn * (2 * xb + 4)
    tm = max(sub, (budget - w_bytes) // max(per_row, 1))
    tm = min(tm, 1024)
    tm = min(tm, _round_up(max(rows, 1), sub))
    if rows >= 2 * sub:      # keep >=2 row-grid steps for the v7x megacore
        tm = min(tm, _round_up(pl.cdiv(rows, 2), sub))
    return max(sub, _round_down_pos(tm, sub)), tn


@jax.jit
def prenorm_linear_pallas(x, gamma, beta, w, bias):
    """fused: Linear(LayerNorm(x)) = ((x - mu)/sigma * g + b) @ w + bias."""
    orig_shape = x.shape
    dim = orig_shape[-1]
    n = w.shape[-1]
    rows = 1
    for s in orig_shape[:-1]:
        rows *= s
    x2 = x.reshape(rows, dim)
    g2 = gamma.reshape(1, dim).astype(jnp.float32)
    b2 = beta.reshape(1, dim).astype(jnp.float32)
    wb2 = bias.reshape(1, n).astype(jnp.float32)

    tm, tn = _pick_fused_tiles(rows, dim, n, x.dtype, w.dtype)
    padded_rows = _round_up(rows, tm)
    if padded_rows != rows:
        x2 = jnp.pad(x2, ((0, padded_rows - rows), (0, 0)))

    xb = jnp.dtype(x.dtype).itemsize
    wbsz = jnp.dtype(w.dtype).itemsize
    tile_bytes = (2 * tm * dim * xb + 2 * dim * tn * wbsz
                  + 2 * tm * tn * xb + tm * dim * 4)

    out = pl.pallas_call(
        _prenorm_linear_kernel,
        out_shape=jax.ShapeDtypeStruct((padded_rows, n), x.dtype),
        grid_spec=pltpu.PrefetchScalarGridSpec(
            num_scalar_prefetch=0,
            grid=(padded_rows // tm, n // tn),
            in_specs=[
                pl.BlockSpec((tm, dim), lambda i, j: (i, 0)),
                pl.BlockSpec((1, dim), lambda i, j: (0, 0)),
                pl.BlockSpec((1, dim), lambda i, j: (0, 0)),
                pl.BlockSpec((dim, tn), lambda i, j: (0, j)),
                pl.BlockSpec((1, tn), lambda i, j: (0, j)),
            ],
            out_specs=pl.BlockSpec((tm, tn), lambda i, j: (i, j)),
        ),
        compiler_params=pltpu.CompilerParams(
            dimension_semantics=("parallel", "parallel"),
            vmem_limit_bytes=_vmem_limit_bytes(tile_bytes),
        ),
    )(x2, g2, b2, w, wb2)

    if padded_rows != rows:
        out = out[:rows]
    return out.reshape(orig_shape[:-1] + (n,))


# ----------------------------------------------------------------------------
# Module-level wrappers (JAX/Pallas equivalent of the PyTorch PreNorm).
# ----------------------------------------------------------------------------
class Linear:
    """Simple dense layer x @ w + b; PreNorm fuses LayerNorm into this matmul."""

    def __init__(self, w, b=None):
        self.w = w
        self.b = b if b is not None else jnp.zeros((w.shape[-1],), w.dtype)

    def __call__(self, x):
        return x @ self.w + self.b


class PreNorm:
    """JAX/Pallas equivalent of the PyTorch PreNorm module."""

    def __init__(self, dim, fn):
        self.dim = dim
        self.fn = fn
        # nn.LayerNorm(dim) default init: weight=1, bias=0.
        self.gamma = jnp.ones((dim,), jnp.float32)
        self.beta = jnp.zeros((dim,), jnp.float32)

    def __call__(self, x, **kwargs):
        # Fast path: fuse LayerNorm into the downstream matmul when fn is a
        # Linear with lane-dense shapes (saves a full HBM write+read of normed x).
        if (isinstance(self.fn, Linear) and not kwargs
                and self.dim % 128 == 0 and self.fn.w.shape[-1] % 128 == 0):
            return prenorm_linear_pallas(x, self.gamma, self.beta,
                                         self.fn.w, self.fn.b)
        # Generic path: `fn` is arbitrary (as in the PyTorch module) — applied
        # as plain-JAX glue on the Pallas LayerNorm output.
        normed = layernorm_pallas(x, self.gamma, self.beta)
        return self.fn(normed, **kwargs)


if __name__ == "__main__":
    key = jax.random.PRNGKey(0)
    k_x, k_w, k_b, k_g, k_beta = jax.random.split(key, 5)

    batch, seq, dim = 2, 8, 128  # dim multiple of 128 -> lane-dense stores
    x = jax.random.normal(k_x, (batch, seq, dim), dtype=jnp.float32)
    w = jax.random.normal(k_w, (dim, dim), dtype=jnp.float32) / jnp.sqrt(dim)
    b = 0.1 * jax.random.normal(k_b, (dim,), dtype=jnp.float32)

    # Non-default affine params to exercise gamma/beta.
    gamma = 1.0 + 0.1 * jax.random.normal(k_g, (dim,), dtype=jnp.float32)
    beta = 0.05 * jax.random.normal(k_beta, (dim,), dtype=jnp.float32)

    # Fused path: PreNorm(Linear) -> single Pallas kernel (LayerNorm + matmul).
    model_fused = PreNorm(dim, Linear(w, b))
    model_fused.gamma, model_fused.beta = gamma, beta

    # Generic path: arbitrary fn -> Pallas LayerNorm + JAX glue.
    model_generic = PreNorm(dim, lambda h: h @ w + b)
    model_generic.gamma, model_generic.beta = gamma, beta

    out_fused = jax.block_until_ready(model_fused(x))
    out_generic = jax.block_until_ready(model_generic(x))
    normed = jax.block_until_ready(layernorm_pallas(x, gamma, beta))

    # Pure-JAX reference.
    mean = jnp.mean(x, axis=-1, keepdims=True)
    var = jnp.mean((x - mean) ** 2, axis=-1, keepdims=True)
    normed_ref = (x - mean) / jnp.sqrt(var + EPS) * gamma + beta
    ref = normed_ref @ w + b

    assert out_fused.shape == (batch, seq, dim)
    assert out_generic.shape == (batch, seq, dim)
    assert jnp.max(jnp.abs(normed - normed_ref)) < 1e-4       # strict LN check
    assert jnp.max(jnp.abs(out_generic - ref)) < 5e-2          # matmul rounding
    assert jnp.max(jnp.abs(out_fused - ref)) < 5e-2            # MXU vs XLA

    print("KERNEL_OK")
</pallas_src>

<mosaic_0001>
module attributes {stable_mosaic.version = 11 : i64} {
  func.func @_prenorm_linear_kernel(%arg0: i32, %arg1: i32, %arg2: memref<8x128xf32, #tpu.memory_space<vmem>>, %arg3: memref<1x128xf32, #tpu.memory_space<vmem>>, %arg4: memref<1x128xf32, #tpu.memory_space<vmem>>, %arg5: memref<128x128xf32, #tpu.memory_space<vmem>>, %arg6: memref<1x128xf32, #tpu.memory_space<vmem>>, %arg7: memref<8x128xf32, #tpu.memory_space<vmem>>) attributes {dimension_semantics = [#tpu.dimension_semantics<parallel>, #tpu.dimension_semantics<parallel>], iteration_bounds = array<i64: 2, 1>, scalar_prefetch = 0 : i64, scratch_operands = 0 : i64, tpu.core_type = #tpu.core_type<tc>, window_params = [{transform_indices = @transform_0, window_bounds = array<i64: 8, 128>}, {pipeline_mode = #tpu.pipeline_mode<synchronous>, transform_indices = @transform_1, window_bounds = array<i64: 1, 128>}, {pipeline_mode = #tpu.pipeline_mode<synchronous>, transform_indices = @transform_2, window_bounds = array<i64: 1, 128>}, {transform_indices = @transform_3, window_bounds = array<i64: 128, 128>}, {transform_indices = @transform_4, window_bounds = array<i64: 1, 128>}, {transform_indices = @transform_5, window_bounds = array<i64: 8, 128>}]} {
    %c0 = arith.constant 0 : index
    %c0_0 = arith.constant 0 : index
    %0 = vector.load %arg2[%c0, %c0_0] : memref<8x128xf32, #tpu.memory_space<vmem>>, vector<8x128xf32>
    %cst = arith.constant dense<0.000000e+00> : vector<8xf32>
    %1 = vector.multi_reduction <add>, %0, %cst [1] : vector<8x128xf32> to vector<8xf32>
    %2 = vector.shape_cast %1 : vector<8xf32> to vector<8x1xf32>
    %cst_1 = arith.constant 1.280000e+02 : f32
    %3 = vector.broadcast %cst_1 : f32 to vector<8x1xf32>
    %4 = arith.divf %2, %3 : vector<8x1xf32>
    %5 = vector.broadcast %4 : vector<8x1xf32> to vector<8x128xf32>
    %6 = arith.subf %0, %5 : vector<8x128xf32>
    %7 = arith.mulf %6, %6 : vector<8x128xf32>
    %cst_2 = arith.constant dense<0.000000e+00> : vector<8xf32>
    %8 = vector.multi_reduction <add>, %7, %cst_2 [1] : vector<8x128xf32> to vector<8xf32>
    %9 = vector.shape_cast %8 : vector<8xf32> to vector<8x1xf32>
    %cst_3 = arith.constant 1.280000e+02 : f32
    %10 = vector.broadcast %cst_3 : f32 to vector<8x1xf32>
    %11 = arith.divf %9, %10 : vector<8x1xf32>
    %cst_4 = arith.constant 9.99999974E-6 : f32
    %12 = vector.broadcast %cst_4 : f32 to vector<8x1xf32>
    %13 = arith.addf %11, %12 : vector<8x1xf32>
    %14 = math.rsqrt %13 : vector<8x1xf32>
    %15 = vector.broadcast %14 : vector<8x1xf32> to vector<8x128xf32>
    %16 = arith.mulf %6, %15 : vector<8x128xf32>
    %c0_5 = arith.constant 0 : index
    %c0_6 = arith.constant 0 : index
    %17 = vector.load %arg3[%c0_5, %c0_6] : memref<1x128xf32, #tpu.memory_space<vmem>>, vector<1x128xf32>
    %18 = vector.broadcast %17 : vector<1x128xf32> to vector<8x128xf32>
    %19 = arith.mulf %16, %18 : vector<8x128xf32>
    %c0_7 = arith.constant 0 : index
    %c0_8 = arith.constant 0 : index
    %20 = vector.load %arg4[%c0_7, %c0_8] : memref<1x128xf32, #tpu.memory_space<vmem>>, vector<1x128xf32>
    %21 = vector.broadcast %20 : vector<1x128xf32> to vector<8x128xf32>
    %22 = arith.addf %19, %21 : vector<8x128xf32>
    %c0_9 = arith.constant 0 : index
    %c0_10 = arith.constant 0 : index
    %23 = vector.load %arg5[%c0_9, %c0_10] : memref<128x128xf32, #tpu.memory_space<vmem>>, vector<128x128xf32>
    %cst_11 = arith.constant dense<0.000000e+00> : vector<8x128xf32>
    %24 = tpu.matmul %22, %23, %cst_11 {dimension_numbers = #tpu.dot_dimension_numbers<[1], [0], [0], [1], [0, 0, 1, 1], [], []>, precision = #tpu.contract_precision<fp32>} : vector<8x128xf32>, vector<128x128xf32>, vector<8x128xf32> -> vector<8x128xf32>
    %c0_12 = arith.constant 0 : index
    %c0_13 = arith.constant 0 : index
    %25 = vector.load %arg6[%c0_12, %c0_13] : memref<1x128xf32, #tpu.memory_space<vmem>>, vector<1x128xf32>
    %26 = vector.broadcast %25 : vector<1x128xf32> to vector<8x128xf32>
    %27 = arith.addf %24, %26 : vector<8x128xf32>
    %c0_14 = arith.constant 0 : index
    %c0_15 = arith.constant 0 : index
    %28 = vector.load %arg7[%c0_14, %c0_15] : memref<8x128xf32, #tpu.memory_space<vmem>>, vector<8x128xf32>
    tpu.vector_store %arg7[%c0_14, %c0_15], %27 {strides = array<i32>} : memref<8x128xf32, #tpu.memory_space<vmem>>, vector<8x128xf32>,
    return
  }
  func.func @transform_0(%arg0: i32, %arg1: i32) -> (i32, i32) {
    %c0_i32 = arith.constant 0 : i32
    %c0_i32_0 = arith.constant 0 : i32
    return %arg0, %c0_i32 : i32, i32
  }
  func.func @transform_1(%arg0: i32, %arg1: i32) -> (i32, i32) {
    %c0_i32 = arith.constant 0 : i32
    %c0_i32_0 = arith.constant 0 : i32
    %c0_i32_1 = arith.constant 0 : i32
    return %c0_i32, %c0_i32_0 : i32, i32
  }
  func.func @transform_2(%arg0: i32, %arg1: i32) -> (i32, i32) {
    %c0_i32 = arith.constant 0 : i32
    %c0_i32_0 = arith.constant 0 : i32
    %c0_i32_1 = arith.constant 0 : i32
    return %c0_i32, %c0_i32_0 : i32, i32
  }
  func.func @transform_3(%arg0: i32, %arg1: i32) -> (i32, i32) {
    %c0_i32 = arith.constant 0 : i32
    %c0_i32_0 = arith.constant 0 : i32
    return %c0_i32, %arg1 : i32, i32
  }
  func.func @transform_4(%arg0: i32, %arg1: i32) -> (i32, i32) {
    %c0_i32 = arith.constant 0 : i32
    %c0_i32_0 = arith.constant 0 : i32
    return %c0_i32, %arg1 : i32, i32
  }
  func.func @transform_5(%arg0: i32, %arg1: i32) -> (i32, i32) {
    %c0_i32 = arith.constant 0 : i32
    return %arg0, %arg1 : i32, i32
  }
}

</mosaic_0001>

<bundles_post_ra>
// kernel: prenorm_linear_pallas.1
= control target key start
LH: loop header
LB: loop body
LE: loop exit
PB: predicated region body
PF: predicated region fallthrough
CT: control target
= control target key end

     0   :  { %10 = vsyncpa [#allocation3], 0  ;;  %s1463_s0 = inlined_call_operand.hbm [shape: f32[16,128], index: 0, kind: input, shape index: {}]   ;;  %s1464_s1 = inlined_call_operand.vmem [shape: f32[1,128], index: 1, kind: input, shape index: {}]   ;;  %s1465_s2 = inlined_call_operand.vmem [shape: f32[1,128], index: 2, kind: input, shape index: {}]   ;;  %s1466_s3 = inlined_call_operand.hbm [shape: f32[128,128], index: 3, kind: input, shape index: {}]   ;;  %s1467_s4 = inlined_call_operand.vmem [shape: f32[1,128], index: 4, kind: input, shape index: {}]   ;;  %s1468_s5 = inlined_call_operand.hbm [shape: f32[16,128], index: 5, kind: output, shape index: {}]  }
   0x1   :  { %12 = vsyncpa [#allocation3 + $0x1], 0 }
   0x2   :  { %13 = vsyncpa [#allocation6], 0 }
   0x3   :  { %14 = vsyncpa [#allocation4], 0 }
   0x4   :  { %16 = vsyncpa [#allocation4 + $0x1], 0  ;;  %s1095_s18 = smov 0   ;;  %s1097_s19 = smov 0  }
   0x5   :  { %s1099_s20 = smov 0   ;;  %s1101_s21 = smov 0  }
   0x6   :  { %s1103_s22 = smov 0   ;;  %s1105_s23 = smov 0  }
   0x7 LB: > { %s814_s24 = sadd.s32 4294967295, %s1059_s23   ;;  %p816_p0 = scmp.ge.s32.totalorder %s1059_s23, 1  ;;  %s1059_s23 = sphi %s1105_s23, %s22_s23   ;;  %s1055_s22 = sphi %s1103_s22, %s1479_s22   ;;  %s1051_s21 = sphi %s1101_s21, %s1478_s21   ;;  %s1047_s20 = sphi %s1099_s20, %s1477_s20   ;;  %s1043_s19 = sphi %s1097_s19, %s1476_s19   ;;  %s1039_s18 = sphi %s1095_s18, %s1475_s18  }
   0x8   : > { %p1127_p1 = scmp.eq.s32.totalorder %s814_s24, 0  ;;  %p187_p2 = scmp.lt.s32.totalorder %s1059_s23, 3 }
   0x9   : > { %s206_s28 = sshll.u32 %s1466_s3, 4  ;;  %s1061_s30 = smov [#allocation5]   ;;  %s207_s28 = int_to_ptr.hbm [resolvable:$true] %s206_s28 }
   0xa   : > { %p1135_p3 = pnand %p816_p0, %p187_p2  ;;  %s208_s6 = sshll.u32 %s1061_s30, 4  ;;  %s209_s6 = int_to_ptr.vmem [resolvable:$true] %s208_s6 }
   0xb   : > { %p819_p6 = scmp.ge.s32.totalorder %s1059_s23, 2  ;;  %s1062_s7 = smov 128  }
   0xc   : > { %p838_p4 = pneg %p1135_p3  ;;  %s1063_s8 = smov 8  }
   0xd   : > { %s815_s9 = sadd.s32 4294967294, %s1059_s23   ;;  %s34_s10 = sadd.s32 1, %s1055_s22 }
   0xe   : > { %p839_p5 = pnand %p838_p4, %p1127_p1  ;;  %s41_s11 = sadd.s32 1, %s1047_s20 }
   0xf   : > { %p36_p7 = scmp.ge.s32.totalorder %s34_s10, 2  ;;  %p48_p8 = scmp.ne.s32.totalorder %s1047_s20, %s1043_s19 }
  0x10   : > { %841 = dma.hbm_to_vmem [thread:$0]  (!%p839_p5), %s207_s28, 2048, %s209_s6, [#allocation6], %s1062_s7, %s1062_s7, %s1063_s8  }
  0x11   : > { %p49_p9 = scmp.eq.s32.totalorder %s1059_s23, 0  ;;  %p54_p10 = scmp.ne.s32.totalorder %s1043_s19, %s1039_s18 }
  0x12   : > { %s1481_s10 = smov (%p36_p7, %s34_s10), 0  ;;  %p174_p13 = scmp.eq.s32.totalorder %s814_s24, 1 }
  0x13   : > { %p1154_p11 = por %p49_p9, %p48_p8  ;;  %p1160_p12 = por %p1127_p1, %p54_p10 }
  0x14   : > { %s38_s14 = ssub.s32 %s1055_s22, %s1481_s10  ;;  %p180_p2 = scmp.eq.s32.totalorder %s815_s9, 1 }
  0x15   : > { %p39_p0 = scmp.eq.s32.totalorder %s38_s14, 0  ;;  %p1166_p4 = por %p174_p13, %p48_p8 }
  0x16   : > { %p851_p5 = scmp.lt.s32.totalorder %s1059_s23, 2  ;;  %p1174_p7 = por %p180_p2, %p54_p10 }
  0x17   : > { %s1172_s16 = scalar_select %p39_p0, %s1047_s20, %s41_s11  }
  0x18   : > { %s228_s26 = sand.u32 1, %s1047_s20   ;;  %s821_s28 = sshll.u32 %s1055_s22, 3 }
  0x19   : > { %s820_s27 = sshll.u32 %s228_s26, 3  ;;  %s236_s24 = scalar_lea.hbm %s1463_s0, %s821_s28 }
  0x1a   : > { %s232_s7 = scalar_lea.vmem [#allocation2], %s820_s27  ;;  %s238_s9 = sshll.u32 %s236_s24, 4  ;;  %s239_s9 = int_to_ptr.hbm [resolvable:$true] %s238_s9 }
  0x1b   : > { %s240_s8 = sshll.u32 %s232_s7, 4  ;;  %p843_p8 = pnand %p851_p5, %p1154_p11  ;;  %s241_s8 = int_to_ptr.vmem [resolvable:$true] %s240_s8 }
  0x1c   : > { %s229_s11 = scalar_lea.sflag [#allocation3], %s228_s26  ;;  %249 = sbr.rel (%p1135_p3) target bundleno = 454 (0x1c6), region = 40 }
  0x1d   : > { %845 = dma.hbm_to_vmem [thread:$0]  (!%p843_p8), %s239_s9, 128, %s241_s8, %s229_s11  }
  0x1e   : > { %s1188_s14 = sand.u32 (!%p1135_p3), 1, %s1043_s19  }
  0x1f   : > { %s823_s28 = sshll.u32 (!%p1135_p3), %s1188_s14, 3  ;;  %s252_s27 = scalar_lea.sflag (!%p1135_p3), [#allocation3], %s1188_s14 }
  0x20   : > { %s255_s30 = scalar_lea.vmem (!%p1135_p3), [#allocation2], %s823_s28 }
  0x21   : > { %1026 = dma.done.wait (%p1160_p12), %s252_s27, 128  }
  0x22   : > { %1028 = vsyncadd (%p1160_p12), %s252_s27, 4294967168 }
  0x23   : > { %1030 = dma.done.wait (%p1127_p1), [#allocation6], 2048  }
  0x24   : > { %1032 = vsyncadd (%p1127_p1), [#allocation6], 4294965248  ;;  %v1202_v0 = vld [vmem:[%s255_s30] sm:$0xff]  ;;  %v1064_v1 = vmov 128.0   ;;  %v345_v4 = vld [vmem:[#allocation5 + $0x68] sm:$0xff]  ;;  %s827_s24 = sshll.u32 %s1051_s21, 3 }
  0x25   : > { %295 = vadd.xlane.f32.xlu0 %v1202_v0  ;;  %909 = vrcp.f32 %v1064_v1  ;;  %v347_v2 = vld [vmem:[#allocation5 + $0x78] sm:$0xff]  ;;  %v346_v3 = vld [vmem:[#allocation5 + $0x70] sm:$0xff]  ;;  %v1209_v7 = vand.u32 4294901760, %v345_v4  ;;  %v344_v8 = vld [vmem:[#allocation5 + $0x60] sm:$0xff]  ;;  %s706_s9 = scalar_lea.hbm %s1468_s5, %s827_s24  ;;  %s290_s11 = scalar_lea.vmem [#allocation7], %s823_s28 }
  0x26   : > { %v1205_v5 = vand.u32 4294901760, %v347_v2  ;;  %v1207_v6 = vand.u32 4294901760, %v346_v3  ;;  %v343_v9 = vld [vmem:[#allocation5 + $0x58] sm:$0xff]  ;;  %v342_v10 = vld [vmem:[#allocation5 + $0x50] sm:$0xff]  ;;  %v1211_v11 = vand.u32 4294901760, %v344_v8  ;;  %v341_v14 = vld [vmem:[#allocation5 + $0x48] sm:$0xff] }
  0x27   : > { %v1213_v12 = vand.u32 4294901760, %v343_v9  ;;  %v1215_v13 = vand.u32 4294901760, %v342_v10  ;;  %v340_v15 = vld [vmem:[#allocation5 + $0x40] sm:$0xff]  ;;  %v1226_v19 = vsub.f32 %v345_v4, %v1209_v7  ;;  %v1229_v20 = vand.u32 4294901760, %v341_v14  ;;  %v339_v37 = vld [vmem:[#allocation5 + $0x38] sm:$0xff]  ;;  %v338_v38 = vld [vmem:[#allocation5 + $0x30] sm:$0xff] }
  0x28   : > { %v1220_v17 = vsub.f32 %v347_v2, %v1205_v5  ;;  %v1223_v18 = vsub.f32 %v346_v3, %v1207_v6  ;;  %353 = vmatpush.msra.mxu0 %v1205_v5  ;;  %549 = vmatpush.msra.mxu3 %v1205_v5  ;;  %v1233_v21 = vsub.f32 %v344_v8, %v1211_v11  ;;  %v1241_v24 = vand.u32 4294901760, %v340_v15  ;;  %v337_v39 = vld [vmem:[#allocation5 + $0x28] sm:$0xff]  ;;  %v336_v46 = vld [vmem:[#allocation5 + $0x20] sm:$0xff]  ;;  %s708_s27 = sshll.u32 %s290_s11, 4  ;;  %s710_s30 = sshll.u32 %s706_s9, 4  ;;  %s709_s27 = int_to_ptr.vmem [resolvable:$true] %s708_s27  ;;  %s711_s30 = int_to_ptr.hbm [resolvable:$true] %s710_s30 }
  0x29   : > { %v1236_v22 = vsub.f32 %v343_v9, %v1213_v12  ;;  %v1239_v23 = vsub.f32 %v342_v10, %v1215_v13  ;;  %v407_v27 = vand.u32 4294901760, %v1226_v19  ;;  %v1252_v31 = vsub.f32 %v341_v14, %v1229_v20  ;;  %s695_s21 = scalar_lea.sflag [#allocation4], %s1188_s14  ;;  %s987_s25 = sshra.s32 %s711_s30, 4  ;;  %s988_s25 = int_to_ptr.hbm [resolvable:$true] %s987_s25 }
  0x2a   : > { %v395_v25 = vand.u32 4294901760, %v1220_v17  ;;  %v401_v26 = vand.u32 4294901760, %v1223_v18  ;;  %355 = vmatpush.msra.mxu0 %v1207_v6  ;;  %496 = vmatpush.msra.mxu2 %v1220_v17  ;;  %v413_v29 = vand.u32 4294901760, %v1233_v21  ;;  %v1268_v36 = vsub.f32 %v340_v15, %v1241_v24  ;;  %s989_s29 = scalar_lea.hbm %s988_s25, 8  ;;  %s993_s28 = scalar_lea.hbm %s1468_s5, 16 }
  0x2b   : > { %v1217_v16 = vpop.eup %909  ;;  %v419_v30 = vand.u32 4294901760, %v1236_v22  ;;  %551 = vmatpush.msra.mxu3 %v1207_v6  ;;  %v408_v34 = vsub.f32 %v1226_v19, %v407_v27  ;;  %v425_v35 = vand.u32 4294901760, %v1239_v23  ;;  %v431_v45 = vand.u32 4294901760, %v1252_v31  ;;  %p990_p1 = scmp.ne.s32.totalorder %s988_s25, %s989_s29  ;;  %p994_p10 = scmp.lt.s32.totalorder %s988_s25, %s1468_s5 }
  0x2c   : > { %v298_v28 = vmul.f32 128.0, %v1217_v16  ;;  %v396_v32 = vsub.f32 %v1220_v17, %v395_v25  ;;  %v402_v33 = vsub.f32 %v1223_v18, %v401_v26  ;;  %357 = vmatpush.msra.mxu0 %v1209_v7  ;;  %499 = vmatpush.msra.mxu2 %v1223_v18  ;;  %v414_v42 = vsub.f32 %v1233_v21, %v413_v29  ;;  %p995_p11 = scmp.lt.s32.totalorder %s993_s28, %s989_s29 }
  0x2d   : > { %553 = vmatpush.msra.mxu3 %v1209_v7  ;;  %v420_v44 = vsub.f32 %v1236_v22, %v419_v30  ;;  %v409_v47 = vand.u32 4294901760, %v408_v34  ;;  %v1282_v48 = vand.u32 4294901760, %v339_v37  ;;  %v1284_v49 = vand.u32 4294901760, %v338_v38  ;;  %p991_p3 = pnand %p990_p1, %p1166_p4 }
  0x2e   : > { %v397_v40 = vand.u32 4294901760, %v396_v32  ;;  %v403_v41 = vand.u32 4294901760, %v402_v33  ;;  %359 = vmatpush.msra.mxu0 %v1211_v11  ;;  %502 = vmatpush.msra.mxu2 %v1226_v19  ;;  %v299_v43 = vsub.f32 1.0, %v298_v28  ;;  %v1286_v50 = vand.u32 4294901760, %v337_v39  ;;  %p996_p12 = por %p995_p11, %p994_p10 }
  0x2f   : > { %555 = vmatpush.msra.mxu3 %v1211_v11  ;;  %v426_v51 = vsub.f32 %v1239_v23, %v425_v35  ;;  %v437_v52 = vand.u32 4294901760, %v1268_v36  ;;  %v415_v53 = vand.u32 4294901760, %v414_v42  ;;  %v1295_v54 = vsub.f32 %v339_v37, %v1282_v48  ;;  %p992_p9 = pneg %p991_p3 }
  0x30   : > { %398 = vmatpush.msra.mxu1 %v397_v40  ;;  %361 = vmatpush.msra.mxu0 %v1213_v12  ;;  %v1299_v55 = vsub.f32 %v338_v38, %v1284_v49  ;;  %v1301_v56 = vand.u32 4294901760, %v336_v46  ;;  %v300_v57 = vmul.f32 %v1217_v16, %v299_v43  ;;  %v421_v58 = vand.u32 4294901760, %v420_v44  ;;  %v335_v43 = vld [vmem:[#allocation5 + $0x18] sm:$0xff] }
  0x31   : > { %505 = vmatpush.msra.mxu2 %v1233_v21  ;;  %557 = vmatpush.msra.mxu3 %v1213_v12  ;;  %v432_v59 = vsub.f32 %v1252_v31, %v431_v45  ;;  %v443_v60 = vand.u32 4294901760, %v1295_v54  ;;  %v1312_v61 = vsub.f32 %v337_v39, %v1286_v50  ;;  %v427_v62 = vand.u32 4294901760, %v426_v51  ;;  %p997_p13 = pnand %p996_p12, %p992_p9 }
  0x32   : > { %404 = vmatpush.msra.mxu1 %v403_v41  ;;  %363 = vmatpush.msra.mxu0 %v1215_v13  ;;  %v438_v63 = vsub.f32 %v1268_v36, %v437_v52  ;;  %v449_v1 = vand.u32 4294901760, %v1299_v55  ;;  %v1322_v2 = vsub.f32 %v336_v46, %v1301_v56  ;;  %v301_v3 = vadd.f32 %v1217_v16, %v300_v57  ;;  %v334_v46 = vld [vmem:[#allocation5 + $0x10] sm:$0xff] }
  0x33   : > { %508 = vmatpush.msra.mxu2 %v1236_v22  ;;  %559 = vmatpush.msra.mxu3 %v1215_v13  ;;  %v433_v4 = vand.u32 4294901760, %v432_v59  ;;  %v444_v8 = vsub.f32 %v1295_v54, %v443_v60  ;;  %v455_v9 = vand.u32 4294901760, %v1312_v61  ;;  %vm302_vm0 = vweird.f32 %v1217_v16  ;;  %v332_v59 = vld [vmem:[#allocation5] sm:$0xff] }
  0x34   : > { %410 = vmatpush.msra.mxu1 %v409_v47  ;;  %365 = vmatpush.msra.mxu0 %v1229_v20  ;;  %v439_v10 = vand.u32 4294901760, %v438_v63  ;;  %v450_v14 = vsub.f32 %v1299_v55, %v449_v1  ;;  %v461_v15 = vand.u32 4294901760, %v1322_v2  ;;  %v1343_v28 = vsel %vm302_vm0, %v1217_v16, %v301_v3 }
  0x35   : > { %511 = vmatpush.msra.mxu2 %v1239_v23  ;;  %561 = vmatpush.msra.mxu3 %v1229_v20  ;;  %v445_v32 = vand.u32 4294901760, %v444_v8  ;;  %v456_v33 = vsub.f32 %v1312_v61, %v455_v9  ;;  %v1364_v44 = vand.u32 4294901760, %v335_v43  ;;  %v1367_v51 = vand.u32 4294901760, %v334_v46  ;;  %v907_v23 = vld [vmem:[%s1465_s2] ss:$0 sm:$0xff] }
  0x36   : > { %416 = vmatpush.msra.mxu1 %v415_v53  ;;  %367 = vmatpush.msra.mxu0 %v1241_v24  ;;  %v451_v37 = vand.u32 4294901760, %v450_v14  ;;  %v462_v16 = vsub.f32 %v1322_v2, %v461_v15 }
  0x37   : > { %514 = vmatpush.msra.mxu2 %v1252_v31  ;;  %563 = vmatpush.msra.mxu3 %v1241_v24  ;;  %v457_v39 = vand.u32 4294901760, %v456_v33  ;;  %v466_v47 = vsub.f32 %v335_v43, %v1364_v44  ;;  %v472_v57 = vsub.f32 %v334_v46, %v1367_v51 }
  0x38   : > { %422 = vmatpush.msra.mxu1 %v421_v58  ;;  %369 = vmatpush.msra.mxu0 %v1282_v48  ;;  %v463_v41 = vand.u32 4294901760, %v462_v16 }
  0x39   : > { %517 = vmatpush.msra.mxu2 %v1268_v36  ;;  %565 = vmatpush.msra.mxu3 %v1282_v48  ;;  %v467_v53 = vand.u32 4294901760, %v466_v47  ;;  %v473_v63 = vand.u32 4294901760, %v472_v57 }
  0x3a   : > { %428 = vmatpush.msra.mxu1 %v427_v62  ;;  %371 = vmatpush.msra.mxu0 %v1284_v49 }
  0x3b   : > { %520 = vmatpush.msra.mxu2 %v1295_v54  ;;  %567 = vmatpush.msra.mxu3 %v1284_v49  ;;  %v468_v62 = vsub.f32 %v466_v47, %v467_v53 }
  0x3c   : > { %434 = vmatpush.msra.mxu1 %v433_v4  ;;  %373 = vmatpush.msra.mxu0 %v1286_v50  ;;  %v382_v4 = vand.u32 4294901760, %v332_v59 }
  0x3d   : > { %523 = vmatpush.msra.mxu2 %v1299_v55  ;;  %569 = vmatpush.msra.mxu3 %v1286_v50  ;;  %v469_v8 = vand.u32 4294901760, %v468_v62 }
  0x3e   : > { %440 = vmatpush.msra.mxu1 %v439_v10  ;;  %375 = vmatpush.msra.mxu0 %v1301_v56  ;;  %v474_v10 = vsub.f32 %v472_v57, %v473_v63 }
  0x3f   : > { %526 = vmatpush.msra.mxu2 %v1312_v61  ;;  %571 = vmatpush.msra.mxu3 %v1301_v56 }
  0x40   : > { %446 = vmatpush.msra.mxu1 %v445_v32  ;;  %377 = vmatpush.msra.mxu0 %v1364_v44  ;;  %v484_v32 = vsub.f32 %v332_v59, %v382_v4  ;;  %v475_v33 = vand.u32 4294901760, %v474_v10 }
  0x41   : > { %529 = vmatpush.msra.mxu2 %v1322_v2  ;;  %573 = vmatpush.msra.mxu3 %v1364_v44 }
  0x42   : > { %452 = vmatpush.msra.mxu1 %v451_v37  ;;  %379 = vmatpush.msra.mxu0 %v1367_v51  ;;  %v485_v37 = vand.u32 4294901760, %v484_v32 }
  0x43   : > { %532 = vmatpush.msra.mxu2 %v466_v47  ;;  %575 = vmatpush.msra.mxu3 %v1367_v51 }
  0x44   : > { %458 = vmatpush.msra.mxu1 %v457_v39 }
  0x45   : > { %535 = vmatpush.msra.mxu2 %v472_v57 }
  0x46   : > { %464 = vmatpush.msra.mxu1 %v463_v41 }
  0x48   : > { %470 = vmatpush.msra.mxu1 %v469_v8 }
  0x4a   : > { %476 = vmatpush.msra.mxu1 %v475_v33 }
  0x98   : > { %v296_v34 = vpop.xlane.xlu0 %295 }
  0x99   : > { %v304_v38 = vmul.f32 %v1343_v28, %v296_v34 }
  0x9b   : > { %v1359_v40 = vsub.f32 %v1202_v0, %v304_v38  ;;  %v333_v0 = vld [vmem:[#allocation5 + $0x8] sm:$0xff]  ;;  %v486_v38 = vsub.f32 %v484_v32, %v485_v37 }
  0x9c   : > { %v380_v58 = vand.u32 4294901760, %v333_v0 }
  0x9d   : > { %v306_v42 = vmul.f32 %v1359_v40, %v1359_v40  ;;  %v487_v39 = vand.u32 4294901760, %v486_v38 }
  0x9e   : > { %v478_v3 = vsub.f32 %v333_v0, %v380_v58  ;;  %381 = vmatpush.msra.mxu0 %v380_v58  ;;  %577 = vmatpush.msra.mxu3 %v380_v58 }
  0x9f   : > { %307 = vadd.xlane.f32.xlu0 %v306_v42 }
  0xa0   : > { %v479_v14 = vand.u32 4294901760, %v478_v3  ;;  %383 = vmatpush.msra.mxu0 %v382_v4  ;;  %538 = vmatpush.msra.mxu2 %v478_v3 }
  0xa1   : > { %579 = vmatpush.msra.mxu3 %v382_v4 }
  0xa2   : > { %590 = vmatpush.msrb.mxu0 %v395_v25  ;;  %v480_v34 = vsub.f32 %v478_v3, %v479_v14  ;;  %541 = vmatpush.msra.mxu2 %v484_v32 }
  0xa4   : > { %594 = vmatpush.msrb.mxu0 %v401_v26  ;;  %v481_v16 = vand.u32 4294901760, %v480_v34 }
  0xa6   : > { %598 = vmatpush.msrb.mxu0 %v407_v27  ;;  %482 = vmatpush.msra.mxu1 %v481_v16 }
  0xa8   : > { %602 = vmatpush.msrb.mxu0 %v413_v29  ;;  %488 = vmatpush.msra.mxu1 %v487_v39 }
  0xaa   : > { %657 = vmatpush.msrb.mxu1 %v1205_v5  ;;  %606 = vmatpush.msrb.mxu0 %v419_v30 }
  0xac   : > { %659 = vmatpush.msrb.mxu1 %v1207_v6  ;;  %610 = vmatpush.msrb.mxu0 %v425_v35  ;;  %v908_v35 = vld [vmem:[%s1467_s4] ss:$0 sm:$0xff] }
  0xae   : > { %661 = vmatpush.msrb.mxu1 %v1209_v7  ;;  %614 = vmatpush.msrb.mxu0 %v431_v45 }
  0xb0   : > { %663 = vmatpush.msrb.mxu1 %v1211_v11  ;;  %618 = vmatpush.msrb.mxu0 %v437_v52 }
  0xb2   : > { %665 = vmatpush.msrb.mxu1 %v1213_v12  ;;  %622 = vmatpush.msrb.mxu0 %v443_v60 }
  0xb4   : > { %667 = vmatpush.msrb.mxu1 %v1215_v13  ;;  %626 = vmatpush.msrb.mxu0 %v449_v1 }
  0xb6   : > { %669 = vmatpush.msrb.mxu1 %v1229_v20  ;;  %630 = vmatpush.msrb.mxu0 %v455_v9  ;;  %v906_v20 = vld [vmem:[%s1464_s1] ss:$0 sm:$0xff] }
  0xb8   : > { %671 = vmatpush.msrb.mxu1 %v1241_v24  ;;  %634 = vmatpush.msrb.mxu0 %v461_v15 }
  0xba   : > { %673 = vmatpush.msrb.mxu1 %v1282_v48  ;;  %638 = vmatpush.msrb.mxu0 %v467_v53 }
  0xbc   : > { %675 = vmatpush.msrb.mxu1 %v1284_v49  ;;  %642 = vmatpush.msrb.mxu0 %v473_v63 }
  0xbe   : > { %677 = vmatpush.msrb.mxu1 %v1286_v50  ;;  %646 = vmatpush.msrb.mxu0 %v479_v14 }
  0xc0   : > { %679 = vmatpush.msrb.mxu1 %v1301_v56  ;;  %650 = vmatpush.msrb.mxu0 %v485_v37 }
  0xc2   : > { %681 = vmatpush.msrb.mxu1 %v1364_v44 }
  0xc4   : > { %683 = vmatpush.msrb.mxu1 %v1367_v51 }
  0xc6   : > { %685 = vmatpush.msrb.mxu1 %v380_v58 }
  0xc8   : > { %687 = vmatpush.msrb.mxu1 %v382_v4 }
 0x112   : > { %v308_v5 = vpop.xlane.xlu0 %307 }
 0x113   : > { %v309_v6 = vmul.f32 %v308_v5, %v1343_v28 }
 0x115   : > { %v310_v7 = vadd.f32 1e-05, %v309_v6 }
 0x117   : > { %911 = vrsqrt.f32 %v310_v7  ;;  %vm317_vm2 = vweird.f32 %v310_v7 }
 0x11d   : > { %v912_v11 = vpop.eup %911 }
 0x11e   : > { %v312_v12 = vmul.f32 %v912_v11, %v310_v7  ;;  %vm318_vm1 = vweird.f32 %v912_v11 }
 0x11f   : > { %vm319_vm3 = vmor %vm317_vm2, %vm318_vm1 }
 0x120   : > { %v313_v13 = vmul.f32 %v912_v11, %v312_v12 }
 0x122   : > { %v314_v17 = vmul.f32 0.5, %v313_v13 }
 0x124   : > { %v315_v18 = vsub.f32 1.5, %v314_v17 }
 0x126   : > { %v316_v19 = vmul.f32 %v912_v11, %v315_v18 }
 0x128   : > { %v320_v21 = vsel %vm319_vm3, %v912_v11, %v316_v19 }
 0x129   : > { %v321_v22 = vmul.f32 %v320_v21, %v1359_v40 }
 0x12b   : > { %v326_v24 = vmul.f32 %v906_v20, %v321_v22 }
 0x12d   : > { %v331_v25 = vadd.f32 %v907_v23, %v326_v24 }
 0x12f   : > { %v384_v26 = vand.u32 4294901760, %v331_v25 }
 0x131   : > { %490 = vmatmul.f32.vlgmr.msra.gmra.mxu1 %v384_v26  ;;  %v385_v27 = vsub.f32 %v331_v25, %v384_v26 }
 0x133   : > { %544 = vmatmul.f32.vlgmr.msra.gmra.mxu2 %v385_v27  ;;  %v386_v29 = vand.u32 4294901760, %v385_v27 }
 0x135   : > { %583 = vmatmul.f32.vlgmr.msra.gmra.mxu3 %v386_v29  ;;  %v387_v30 = vsub.f32 %v385_v27, %v386_v29 }
 0x137   : > { %v388_v31 = vand.u32 4294901760, %v387_v30 }
 0x139   : > { %389 = vmatmul.f32.vlgmr.msra.gmra.mxu0 %v388_v31  ;;  %689 = vmatmul.f32.vlgmr.msrb.gmra.mxu1 %v384_v26 }
 0x141   : > { %652 = vmatmul.f32.vlgmr.msrb.gmra.mxu0 %v384_v26 }
 0x1ae   : > { %v491_v36 = vpop.f32.mrf.mxu1 }
 0x1b6   : > { %v390_v45 = vpop.f32.mrf.mxu0  ;;  %v545_v50 = vpop.f32.mrf.mxu2 }
 0x1b7   : > { %v391_v48 = vadd.f32 %v908_v35, %v390_v45  ;;  %v690_v61 = vpop.f32.mrf.mxu1 }
 0x1b8   : > { %v584_v54 = vpop.f32.mrf.mxu3 }
 0x1b9   : > { %v492_v49 = vadd.f32 %v491_v36, %v391_v48 }
 0x1bb   : > { %v546_v52 = vadd.f32 %v545_v50, %v492_v49 }
 0x1bd   : > { %v585_v55 = vadd.f32 %v584_v54, %v546_v52 }
 0x1be   : > { %v653_v56 = vpop.f32.mrf.mxu0 }
 0x1bf   : > { %v654_v60 = vadd.f32 %v653_v56, %v585_v55 }
 0x1c1   : > { %v691_v1 = vadd.f32 %v690_v61, %v654_v60 }
 0x1c3   : > { %693 = vst [vmem:[%s290_s11] sm:$0xff] %v691_v1 }
 0x1c4   : > { %1000 = shalt.err (!%p997_p13)
}
 0x1c5   : > { %836 = dma.vmem_to_hbm [thread:$0]  (%p1166_p4), %s709_s27, 128, %s711_s30, %s695_s21  }
 0x1c6 PF: > { %s722_s14 = sand.u32 1, %s1039_s18   ;;  %p847_p0 = pnand %p819_p6, %p1174_p7 }
 0x1c7   : > { %s723_s24 = scalar_lea.sflag [#allocation4], %s722_s14 }
 0x1c8   : > { %p848_p2 = pneg %p847_p0 }
 0x1ca   : > { %1034 = dma.done.wait (%p848_p2), %s723_s24, 128  }
 0x1cb   : > { %1036 = vsyncadd (%p848_p2), %s723_s24, 4294967168  ;;  %s22_s23 = sadd.s32 1, %s1059_s23   ;;  %s1475_s18 = smov %s1043_s19 }
 0x1cc   : > { %p19_p5 = scmp.ge.s32.totalorder %s22_s23, 4   ;;  %s1476_s19 = smov %s1047_s20 }
 0x1cd   : > { %s1477_s20 = smov %s1172_s16  ;;  %s1478_s21 = smov %s1055_s22 }
 0x1ce   : > { %s1479_s22 = smov %s1481_s10  ;;  %21 = sbr.rel (!%p19_p5) target bundleno = 7 (0x7), region = 93 }
 0x1d3   :  { %729 = vsyncpa [#allocation3], 1 }
 0x1d4   :  { %731 = vsyncpa [#allocation3 + $0x1], 1 }
 0x1d5   :  { %732 = vsyncpa [#allocation6], 1 }
 0x1d6   :  { %733 = vsyncpa [#allocation4], 1 }
 0x1d7   :  { %735 = vsyncpa [#allocation4 + $0x1], 1 }

</bundles_post_ra>
